<compile_context>
chip_gen: v5e
topology: v5e:2x2
jax: 0.10.0
libtpu: 0.0.40
codegen_flags: <defaults>
</compile_context>

<pallas_src>
import functools

import jax
import jax.numpy as jnp
from jax.experimental import pallas as pl
from jax.experimental.pallas import tpu as pltpu


# ---------------------------------------------------------------------------
# Fused kernel:  o = relu(x @ W^T + b) + x      (one row-tile per grid step)
# ---------------------------------------------------------------------------
def _residual_kernel(x_ref, wt_ref, b_ref, o_ref):
    x = x_ref[...]                                    # (tm, D) f32
    # Canonical contraction on a pre-transposed bf16 weight: lane-dense MXU feed,
    # no in-kernel transpose; f32 accumulation on the MXU.
    y = jnp.dot(x.astype(jnp.bfloat16), wt_ref[...],
                preferred_element_type=jnp.float32)   # (tm, D) f32
    y = y + b_ref[...]                                # bias broadcast over rows (f32)
    y = jnp.maximum(y, 0.0)                           # ReLU
    o_ref[...] = (y + x).astype(o_ref.dtype)          # residual add in f32


def residual_rows(x2d, w_t_bf16, b, *, tm=4096):
    """x2d: (M, D) f32, w_t_bf16: (D, D) = W^T in bf16, b: (D,) f32 -> (M, D)."""
    M, D = x2d.shape
    assert w_t_bf16.shape == (D, D) and b.shape == (D,)

    # --- Row tile selection -------------------------------------------------
    tm_eff = max(8, min(int(tm), M))
    tm_eff = ((tm_eff + 7) // 8) * 8                  # sublane (8) alignment
    # Keep >= 2 grid steps when possible so the "parallel" axis can feed both
    # TensorCores on v7x instead of leaving one idle.
    if pl.cdiv(M, tm_eff) < 2 and M >= 16:
        tm_eff = ((pl.cdiv(M, 2) + 7) // 8) * 8
    n_steps = pl.cdiv(M, tm_eff)
    M_pad = n_steps * tm_eff

    # Zero-pad ragged rows: padded rows compute relu(b) (finite, no NaNs) and are
    # sliced off by the caller.
    if M_pad != M:
        x2d = jnp.pad(x2d, ((0, M_pad - M), (0, 0)))

    # --- Scoped VMEM: only bump when large tiles need it --------------------
    # double-buffered x + out (f32) + weight/bias; cap well under v7x's 64 MiB.
    needed = 2 * (2 * tm_eff * D * 4) + 2 * (D * D * 2) + 2 * (D * 4)
    vmem_limit = None
    if needed > (14 << 20):
        vmem_limit = min(int(needed * 1.25) + (2 << 20), 48 << 20)

    cost = pl.CostEstimate(
        flops=2 * M_pad * D * D,
        bytes_accessed=2 * M_pad * D * 4 + D * D * 2 + D * 4,
        transcendentals=0,
    )

    return pl.pallas_call(
        _residual_kernel,
        grid=(n_steps,),
        out_shape=jax.ShapeDtypeStruct((M_pad, D), x2d.dtype),
        in_specs=[
            pl.BlockSpec((tm_eff, D), lambda i: (i, 0)),   # activation tile (streamed)
            pl.BlockSpec((D, D), lambda i: (0, 0)),        # W^T bf16 (VMEM-resident)
            pl.BlockSpec((1, D), lambda i: (0, 0)),        # bias f32 (VMEM-resident)
        ],
        out_specs=pl.BlockSpec((tm_eff, D), lambda i: (i, 0)),
        compiler_params=pltpu.CompilerParams(
            dimension_semantics=("parallel",),
            vmem_limit_bytes=vmem_limit),
        cost_estimate=cost,
    )(x2d, w_t_bf16, b.reshape(1, D))[:M]


@functools.partial(jax.jit, static_argnames=("tm",))
def residual_forward(embs, w, b, *, tm=4096):
    """embs: (..., D) -> (..., D);  Residual.forward in eval mode.

    w is the PyTorch-convention (out, in) spectral-normalized weight; transposed
    once here (outside the kernel) and stored bf16 for a clean MXU feed.
    """
    D = embs.shape[-1]
    x2d = embs.reshape(-1, D).astype(jnp.float32)
    w_t_bf16 = w.T.astype(jnp.bfloat16)
    out = residual_rows(x2d, w_t_bf16, b.astype(jnp.float32), tm=tm)
    return out.reshape(embs.shape).astype(embs.dtype)


# ---------------------------------------------------------------------------
# Parameter construction (spec-faithful) + pure-JAX reference
# ---------------------------------------------------------------------------
def spectral_normalize(w):
    sigma = jnp.linalg.svd(w, compute_uv=False)[0]
    return w / sigma


def init_params(input_dims):
    # Projection(input_dims, input_dims): square -> eye_ init, zero bias, spectral_norm.
    w = jnp.eye(input_dims, dtype=jnp.float32)
    w = spectral_normalize(w)
    b = jnp.zeros((input_dims,), jnp.float32)
    return w, b


def reference_forward(embs, w, b):
    y = embs @ w.T + b
    y = jnp.maximum(y, 0.0)
    return y + embs


if __name__ == "__main__":
    B, S, D = 4, 128, 128          # M = 512 rows -> tm auto-split into 2 grid steps

    root = jax.random.PRNGKey(0)
    kx, kw = jax.random.split(root, 2)
    embs = jax.random.normal(kx, (B, S, D), jnp.float32)

    # (1) spec-faithful parameters (eye init + spectral norm -> identity weight)
    w_spec, b_spec = init_params(D)
    out = jax.block_until_ready(residual_forward(embs, w_spec, b_spec))
    ref = reference_forward(embs, w_spec, b_spec)
    assert out.shape == (B, S, D)
    assert jnp.allclose(out, ref, atol=5e-2, rtol=5e-2), (
        float(jnp.max(jnp.abs(out - ref))))

    # (2) non-trivial spectral-normalized weight to exercise the matmul path,
    #     plus a tm that forces a ragged (padded) last tile.
    w_rand = spectral_normalize(
        jax.random.normal(kw, (D, D), jnp.float32) * (1.0 / jnp.sqrt(D)))
    b_rand = jnp.full((D,), 0.01, jnp.float32)
    out2 = jax.block_until_ready(residual_forward(embs, w_rand, b_rand, tm=200))
    ref2 = reference_forward(embs, w_rand, b_rand)
    assert jnp.allclose(out2, ref2, atol=5e-2, rtol=5e-2), (
        float(jnp.max(jnp.abs(out2 - ref2))))

    print("KERNEL_OK")
</pallas_src>

<mosaic_0001>
module attributes {stable_mosaic.version = 11 : i64} {
  func.func @_residual_kernel(%arg0: i32, %arg1: memref<256x128xf32, #tpu.memory_space<vmem>>, %arg2: memref<128x128xbf16, #tpu.memory_space<vmem>>, %arg3: memref<1x128xf32, #tpu.memory_space<vmem>>, %arg4: memref<256x128xf32, #tpu.memory_space<vmem>>) attributes {dimension_semantics = [#tpu.dimension_semantics<parallel>], iteration_bounds = array<i64: 2>, scalar_prefetch = 0 : i64, scratch_operands = 0 : i64, tpu.core_type = #tpu.core_type<tc>, window_params = [{transform_indices = @transform_0, window_bounds = array<i64: 256, 128>}, {pipeline_mode = #tpu.pipeline_mode<synchronous>, transform_indices = @transform_1, window_bounds = array<i64: 128, 128>}, {pipeline_mode = #tpu.pipeline_mode<synchronous>, transform_indices = @transform_2, window_bounds = array<i64: 1, 128>}, {transform_indices = @transform_3, window_bounds = array<i64: 256, 128>}]} {
    %c0 = arith.constant 0 : index
    %c0_0 = arith.constant 0 : index
    %0 = vector.load %arg1[%c0, %c0_0] : memref<256x128xf32, #tpu.memory_space<vmem>>, vector<256x128xf32>
    %1 = arith.truncf %0 : vector<256x128xf32> to vector<256x128xbf16>
    %c0_1 = arith.constant 0 : index
    %c0_2 = arith.constant 0 : index
    %2 = vector.load %arg2[%c0_1, %c0_2] : memref<128x128xbf16, #tpu.memory_space<vmem>>, vector<128x128xbf16>
    %cst = arith.constant dense<0.000000e+00> : vector<256x128xf32>
    %3 = tpu.matmul %1, %2, %cst {dimension_numbers = #tpu.dot_dimension_numbers<[1], [0], [0], [1], [0, 0, 1, 1], [], []>} : vector<256x128xbf16>, vector<128x128xbf16>, vector<256x128xf32> -> vector<256x128xf32>
    %c0_3 = arith.constant 0 : index
    %c0_4 = arith.constant 0 : index
    %4 = vector.load %arg3[%c0_3, %c0_4] : memref<1x128xf32, #tpu.memory_space<vmem>>, vector<1x128xf32>
    %5 = vector.broadcast %4 : vector<1x128xf32> to vector<256x128xf32>
    %6 = arith.addf %3, %5 : vector<256x128xf32>
    %cst_5 = arith.constant 0.000000e+00 : f32
    %7 = vector.broadcast %cst_5 : f32 to vector<256x128xf32>
    %8 = arith.maximumf %6, %7 : vector<256x128xf32>
    %9 = arith.addf %8, %0 : vector<256x128xf32>
    %c0_6 = arith.constant 0 : index
    %c0_7 = arith.constant 0 : index
    %10 = vector.load %arg4[%c0_6, %c0_7] : memref<256x128xf32, #tpu.memory_space<vmem>>, vector<256x128xf32>
    tpu.vector_store %arg4[%c0_6, %c0_7], %9 {strides = array<i32>} : memref<256x128xf32, #tpu.memory_space<vmem>>, vector<256x128xf32>,
    return
  }
  func.func @transform_0(%arg0: i32) -> (i32, i32) {
    %c0_i32 = arith.constant 0 : i32
    %c0_i32_0 = arith.constant 0 : i32
    return %arg0, %c0_i32 : i32, i32
  }
  func.func @transform_1(%arg0: i32) -> (i32, i32) {
    %c0_i32 = arith.constant 0 : i32
    %c0_i32_0 = arith.constant 0 : i32
    %c0_i32_1 = arith.constant 0 : i32
    return %c0_i32, %c0_i32_0 : i32, i32
  }
  func.func @transform_2(%arg0: i32) -> (i32, i32) {
    %c0_i32 = arith.constant 0 : i32
    %c0_i32_0 = arith.constant 0 : i32
    %c0_i32_1 = arith.constant 0 : i32
    return %c0_i32, %c0_i32_0 : i32, i32
  }
  func.func @transform_3(%arg0: i32) -> (i32, i32) {
    %c0_i32 = arith.constant 0 : i32
    %c0_i32_0 = arith.constant 0 : i32
    return %arg0, %c0_i32 : i32, i32
  }
}

</mosaic_0001>

<bundles_post_ra>
// kernel: residual_forward.1
= control target key start
LH: loop header
LB: loop body
LE: loop exit
PB: predicated region body
PF: predicated region fallthrough
CT: control target
= control target key end

     0   :  { %8 = vsyncpa [#allocation3], 0  ;;  %s1225_s0 = inlined_call_operand.hbm [shape: f32[512,128], index: 0, kind: input, shape index: {}]   ;;  %s1226_s1 = inlined_call_operand.vmem [shape: bf16[128,128], index: 1, kind: input, shape index: {}]   ;;  %s1227_s2 = inlined_call_operand.vmem [shape: f32[1,128], index: 2, kind: input, shape index: {}]   ;;  %s1228_s3 = inlined_call_operand.hbm [shape: f32[512,128], index: 3, kind: output, shape index: {}]  }
   0x1   :  { %10 = vsyncpa [#allocation3 + $0x1], 0 }
   0x2   :  { %11 = vsyncpa [#allocation4], 0 }
   0x3   :  { %13 = vsyncpa [#allocation4 + $0x1], 0  ;;  %s836_s12 = smov 0   ;;  %s838_s13 = smov 0  }
   0x4   :  { %s840_s14 = smov 0   ;;  %s842_s15 = smov 0  }
   0x5 LB: > { %s857_s16 = sadd.s32 4294967295, %s810_s15   ;;  %s583_s17 = sadd.s32 4294967294, %s810_s15   ;;  %s810_s15 = sphi %s842_s15, %s1238_s15   ;;  %s806_s14 = sphi %s840_s14, %s1237_s14   ;;  %s802_s13 = sphi %s838_s13, %s1236_s13   ;;  %s798_s12 = sphi %s836_s12, %s1235_s12  }
   0x6   : > { %s861_s18 = sadd.s32 1, %s810_s15   ;;  %s26_s19 = sadd.s32 1, %s806_s14 }
   0x7   : > { %s23_s20 = ssub.s32 %s810_s15, %s861_s18  ;;  %p33_p0 = scmp.ne.s32.totalorder %s806_s14, %s802_s13 }
   0x8   : > { %p24_p1 = scmp.eq.s32.totalorder %s23_s20, 0  ;;  %p34_p2 = scmp.eq.s32.totalorder %s810_s15, 0 }
   0x9   : > { %p39_p3 = scmp.ne.s32.totalorder %s802_s13, %s798_s12  ;;  %p40_p4 = scmp.eq.s32.totalorder %s857_s16, 0 }
   0xa   : > { %s873_s21 = scalar_select %p24_p1, %s806_s14, %s26_s19  }
   0xb   : > { %p875_p5 = por %p34_p2, %p33_p0  ;;  %p879_p6 = por %p40_p4, %p39_p3 }
   0xc   : > { %p105_p7 = scmp.eq.s32.totalorder %s857_s16, 1  ;;  %p111_p8 = scmp.eq.s32.totalorder %s583_s17, 1 }
   0xd   : > { %p675_p10 = scmp.lt.s32.totalorder %s810_s15, 2  ;;  %s137_s26 = sand.u32 1, %s806_s14  }
   0xe   : > { %p886_p11 = por %p105_p7, %p33_p0  ;;  %p890_p12 = por %p111_p8, %p39_p3 }
   0xf   : > { %s629_s27 = sshll.u32 %s810_s15, 8  ;;  %s586_s28 = sshll.u32 %s137_s26, 8 }
  0x10   : > { %s146_s4 = scalar_lea.hbm %s1225_s0, %s629_s27  ;;  %s141_s6 = scalar_lea.vmem [#allocation2], %s586_s28 }
  0x11   : > { %s147_s5 = sshll.u32 %s146_s4, 4  ;;  %s149_s7 = sshll.u32 %s141_s6, 4  ;;  %s148_s5 = int_to_ptr.hbm [resolvable:$true] %s147_s5  ;;  %s150_s7 = int_to_ptr.vmem [resolvable:$true] %s149_s7 }
  0x12   : > { %p901_p13 = pnand %p675_p10, %p875_p5  ;;  %p589_p0 = scmp.ge.s32.totalorder %s810_s15, 1 }
  0x13   : > { %p157_p1 = scmp.lt.s32.totalorder %s810_s15, 3  ;;  %s138_s9 = scalar_lea.sflag [#allocation3], %s137_s26 }
  0x14   : > { %s714_s10 = sshra.s32 %s148_s5, 4  ;;  %p718_p3 = pneg %p901_p13  ;;  %s715_s10 = int_to_ptr.hbm [resolvable:$true] %s714_s10 }
  0x15   : > { %s716_s11 = scalar_lea.hbm %s715_s10, 256  ;;  %s721_s20 = scalar_lea.hbm %s1225_s0, 512 }
  0x16   : > { %p717_p2 = scmp.ne.s32.totalorder %s715_s10, %s716_s11  ;;  %p722_p5 = scmp.lt.s32.totalorder %s715_s10, %s1225_s0 }
  0x17   : > { %p723_p8 = scmp.lt.s32.totalorder %s721_s20, %s716_s11 }
  0x18   : > { %p719_p4 = pnand %p718_p3, %p717_p2 }
  0x19   : > { %p724_p10 = por %p723_p8, %p722_p5 }
  0x1a   : > { %p720_p7 = pneg %p719_p4 }
  0x1c   : > { %p725_p9 = pnand %p724_p10, %p720_p7 }
  0x1e   : > { %728 = shalt.err (!%p725_p9)
}
  0x1f   : > { %s812_s26 = smov 128   ;;  %s813_s28 = smov 8  }
  0x20   : > { %670 = dma.hbm_to_vmem [thread:$0]  (!%p901_p13), %s148_s5, 4096, %s150_s7, %s138_s9, %s812_s26, %s812_s26, %s813_s28  }
  0x21   : > { %p158_p2 = pnand %p589_p0, %p157_p1 }
  0x22   : > { %s922_s29 = sand.u32 (!%p158_p2), 1, %s802_s13  }
  0x23   : > { %161 = sbr.rel (%p158_p2) target bundleno = 273 (0x111), region = 32  ;;  %s590_s30 = sshll.u32 (!%p158_p2), %s922_s29, 8 }
  0x24   : > { %s164_s4 = scalar_lea.sflag (!%p158_p2), [#allocation3], %s922_s29  ;;  %s928_s6 = scalar_lea.vmem (!%p158_p2), [#allocation2], %s590_s30 }
  0x28   : > { %789 = dma.done.wait (%p879_p6), %s164_s4, 4096  }
  0x29   : > { %791 = vsyncadd (%p879_p6), %s164_s4, 4294963200  ;;  %v637_v0 = vld [vmem:[%s1226_s1 + $0x38] sm:$0xff]  ;;  %v636_v1 = vld [vmem:[%s1226_s1 + $0x30] sm:$0xff]  ;;  %s1097_s8 = scalar_lea.vmem [#allocation5], %s590_s30  ;;  %s638_s30 = sshll.u32 %s857_s16, 8 }
  0x2a   : > { %309 = vmatpush.bf16.msra.mxu0 %v637_v0  ;;  %639 = vmatpush.bf16.msra.mxu1 %v637_v0  ;;  %v635_v2 = vld [vmem:[%s1226_s1 + $0x28] sm:$0xff]  ;;  %v634_v3 = vld [vmem:[%s1226_s1 + $0x20] sm:$0xff]  ;;  %v633_v4 = vld [vmem:[%s1226_s1 + $0x18] sm:$0xff]  ;;  %s506_s11 = scalar_lea.hbm %s1228_s3, %s638_s30  ;;  %s507_s16 = sshll.u32 %s1097_s8, 4  ;;  %s508_s16 = int_to_ptr.vmem [resolvable:$true] %s507_s16 }
  0x2b   : > { %640 = vmatpush.bf16.msra.mxu2 %v637_v0  ;;  %641 = vmatpush.bf16.msra.mxu3 %v637_v0  ;;  %v632_v5 = vld [vmem:[%s1226_s1 + $0x10] sm:$0xff]  ;;  %v631_v6 = vld [vmem:[%s1226_s1 + $0x8] sm:$0xff]  ;;  %v630_v7 = vld [vmem:[%s1226_s1] sm:$0xff]  ;;  %s509_s23 = sshll.u32 %s506_s11, 4  ;;  %s495_s17 = scalar_lea.sflag [#allocation4], %s922_s29  ;;  %s510_s23 = int_to_ptr.hbm [resolvable:$true] %s509_s23 }
  0x2c   : > { %v959_v8 = vld [vmem:[%s928_s6] sm:$0xff]  ;;  %v962_v9 = vld [vmem:[%s928_s6 + $0x8] sm:$0xff]  ;;  %v991_v20 = vld [vmem:[%s928_s6 + $0x10] sm:$0xff]  ;;  %s758_s19 = sshra.s32 %s510_s23, 4  ;;  %s764_s26 = scalar_lea.hbm %s1228_s3, 512  ;;  %s759_s19 = int_to_ptr.hbm [resolvable:$true] %s758_s19 }
  0x2d   : > { %v965_v10 = vld [vmem:[%s928_s6 + $0x40] sm:$0xff]  ;;  %v968_v11 = vld [vmem:[%s928_s6 + $0x48] sm:$0xff]  ;;  %v225_v16 = vpack.c.bf16 %v962_v9, %v959_v8  ;;  %v994_v21 = vld [vmem:[%s928_s6 + $0x18] sm:$0xff]  ;;  %s760_s20 = scalar_lea.hbm %s759_s19, 256  ;;  %p765_p0 = scmp.lt.s32.totalorder %s759_s19, %s1228_s3 }
  0x2e   : > { %310 = vmatpush.bf16.msra.mxu0 %v636_v1  ;;  %642 = vmatpush.bf16.msra.mxu1 %v636_v1  ;;  %v971_v12 = vld [vmem:[%s928_s6 + $0x80] sm:$0xff]  ;;  %v974_v13 = vld [vmem:[%s928_s6 + $0x88] sm:$0xff]  ;;  %v229_v17 = vpack.c.bf16 %v968_v11, %v965_v10  ;;  %v997_v22 = vld [vmem:[%s928_s6 + $0x50] sm:$0xff]  ;;  %v226_v28 = vpack.c.bf16 %v994_v21, %v991_v20  ;;  %p761_p6 = scmp.ne.s32.totalorder %s759_s19, %s760_s20  ;;  %p766_p1 = scmp.lt.s32.totalorder %s764_s26, %s760_s20 }
  0x2f   : > { %643 = vmatpush.bf16.msra.mxu2 %v636_v1  ;;  %644 = vmatpush.bf16.msra.mxu3 %v636_v1  ;;  %v977_v14 = vld [vmem:[%s928_s6 + $0xc0] sm:$0xff]  ;;  %v980_v15 = vld [vmem:[%s928_s6 + $0xc8] sm:$0xff]  ;;  %v233_v18 = vpack.c.bf16 %v974_v13, %v971_v12  ;;  %v1000_v23 = vld [vmem:[%s928_s6 + $0x58] sm:$0xff] }
  0x30   : > { %v237_v19 = vpack.c.bf16 %v980_v15, %v977_v14  ;;  %v1003_v24 = vld [vmem:[%s928_s6 + $0x90] sm:$0xff]  ;;  %v1006_v25 = vld [vmem:[%s928_s6 + $0x98] sm:$0xff]  ;;  %v230_v29 = vpack.c.bf16 %v1000_v23, %v997_v22  ;;  %v1023_v32 = vld [vmem:[%s928_s6 + $0x20] sm:$0xff]  ;;  %p762_p9 = pnand %p761_p6, %p886_p11  ;;  %p767_p3 = por %p766_p1, %p765_p0 }
  0x31   : > { %v1009_v26 = vld [vmem:[%s928_s6 + $0xd0] sm:$0xff]  ;;  %v1012_v27 = vld [vmem:[%s928_s6 + $0xd8] sm:$0xff]  ;;  %v234_v30 = vpack.c.bf16 %v1006_v25, %v1003_v24  ;;  %v1026_v33 = vld [vmem:[%s928_s6 + $0x28] sm:$0xff] }
  0x32   : > { %311 = vmatpush.bf16.msra.mxu0 %v635_v2  ;;  %645 = vmatpush.bf16.msra.mxu1 %v635_v2  ;;  %v238_v31 = vpack.c.bf16 %v1012_v27, %v1009_v26  ;;  %v1029_v34 = vld [vmem:[%s928_s6 + $0x60] sm:$0xff]  ;;  %v1032_v35 = vld [vmem:[%s928_s6 + $0x68] sm:$0xff]  ;;  %v227_v40 = vpack.c.bf16 %v1026_v33, %v1023_v32  ;;  %v1055_v44 = vld [vmem:[%s928_s6 + $0x30] sm:$0xff]  ;;  %p763_p13 = pneg %p762_p9 }
  0x33   : > { %646 = vmatpush.bf16.msra.mxu2 %v635_v2  ;;  %647 = vmatpush.bf16.msra.mxu3 %v635_v2  ;;  %v1035_v36 = vld [vmem:[%s928_s6 + $0xa0] sm:$0xff]  ;;  %v1038_v37 = vld [vmem:[%s928_s6 + $0xa8] sm:$0xff]  ;;  %v231_v41 = vpack.c.bf16 %v1032_v35, %v1029_v34  ;;  %v1058_v45 = vld [vmem:[%s928_s6 + $0x38] sm:$0xff] }
  0x34   : > { %v1041_v38 = vld [vmem:[%s928_s6 + $0xe0] sm:$0xff]  ;;  %v1044_v39 = vld [vmem:[%s928_s6 + $0xe8] sm:$0xff]  ;;  %v235_v42 = vpack.c.bf16 %v1038_v37, %v1035_v36  ;;  %v1061_v46 = vld [vmem:[%s928_s6 + $0x70] sm:$0xff]  ;;  %v228_v52 = vpack.c.bf16 %v1058_v45, %v1055_v44  ;;  %p768_p4 = pnand %p767_p3, %p763_p13 }
  0x35   : > { %v239_v43 = vpack.c.bf16 %v1044_v39, %v1041_v38  ;;  %v1064_v47 = vld [vmem:[%s928_s6 + $0x78] sm:$0xff]  ;;  %v1067_v48 = vld [vmem:[%s928_s6 + $0xb0] sm:$0xff]  ;;  %v1089_v56 = vld [vmem:[%s1227_s2] ss:$0 sm:$0xff] }
  0x36   : > { %312 = vmatpush.bf16.msra.mxu0 %v634_v3  ;;  %648 = vmatpush.bf16.msra.mxu1 %v634_v3  ;;  %v1070_v49 = vld [vmem:[%s928_s6 + $0xb8] sm:$0xff]  ;;  %v1073_v50 = vld [vmem:[%s928_s6 + $0xf0] sm:$0xff]  ;;  %v232_v53 = vpack.c.bf16 %v1064_v47, %v1061_v46 }
  0x37   : > { %649 = vmatpush.bf16.msra.mxu2 %v634_v3  ;;  %650 = vmatpush.bf16.msra.mxu3 %v634_v3  ;;  %v1076_v51 = vld [vmem:[%s928_s6 + $0xf8] sm:$0xff]  ;;  %v236_v54 = vpack.c.bf16 %v1070_v49, %v1067_v48 }
  0x38   : > { %v240_v55 = vpack.c.bf16 %v1076_v51, %v1073_v50 }
  0x3a   : > { %313 = vmatpush.bf16.msra.mxu0 %v633_v4  ;;  %651 = vmatpush.bf16.msra.mxu1 %v633_v4 }
  0x3b   : > { %652 = vmatpush.bf16.msra.mxu2 %v633_v4  ;;  %653 = vmatpush.bf16.msra.mxu3 %v633_v4 }
  0x3e   : > { %314 = vmatpush.bf16.msra.mxu0 %v632_v5  ;;  %654 = vmatpush.bf16.msra.mxu1 %v632_v5 }
  0x3f   : > { %655 = vmatpush.bf16.msra.mxu2 %v632_v5  ;;  %656 = vmatpush.bf16.msra.mxu3 %v632_v5 }
  0x42   : > { %315 = vmatpush.bf16.msra.mxu0 %v631_v6  ;;  %657 = vmatpush.bf16.msra.mxu1 %v631_v6 }
  0x43   : > { %658 = vmatpush.bf16.msra.mxu2 %v631_v6  ;;  %659 = vmatpush.bf16.msra.mxu3 %v631_v6 }
  0x46   : > { %316 = vmatpush.bf16.msra.mxu0 %v630_v7  ;;  %660 = vmatpush.bf16.msra.mxu1 %v630_v7 }
  0x47   : > { %661 = vmatpush.bf16.msra.mxu2 %v630_v7  ;;  %662 = vmatpush.bf16.msra.mxu3 %v630_v7 }
  0x49   : > { %317 = vmatmul.bf16.vlgmr.msra.gmra.mxu0 %v225_v16  ;;  %337 = vmatmul.bf16.vlgmr.msra.gmra.mxu1 %v229_v17 }
  0x4a   : > { %357 = vmatmul.bf16.vlgmr.msra.gmra.mxu2 %v233_v18  ;;  %377 = vmatmul.bf16.vlgmr.msra.gmra.mxu3 %v237_v19 }
  0x59   : > { %322 = vmatmul.bf16.gmra.mxu0 %v226_v28  ;;  %342 = vmatmul.bf16.gmra.mxu1 %v230_v29 }
  0x5a   : > { %362 = vmatmul.bf16.gmra.mxu2 %v234_v30  ;;  %382 = vmatmul.bf16.gmra.mxu3 %v238_v31 }
  0x69   : > { %327 = vmatmul.bf16.gmra.mxu0 %v227_v40  ;;  %347 = vmatmul.bf16.gmra.mxu1 %v231_v41 }
  0x6a   : > { %367 = vmatmul.bf16.gmra.mxu2 %v235_v42  ;;  %387 = vmatmul.bf16.gmra.mxu3 %v239_v43 }
  0x79   : > { %332 = vmatmul.bf16.gmra.mxu0 %v228_v52  ;;  %352 = vmatmul.bf16.gmra.mxu1 %v232_v53 }
  0x7a   : > { %372 = vmatmul.bf16.gmra.mxu2 %v236_v54  ;;  %392 = vmatmul.bf16.gmra.mxu3 %v240_v55 }
  0xc6   : > { %v318_v57 = vpop.f32.mrf.mxu0  ;;  %v338_v58 = vpop.f32.mrf.mxu1 }
  0xc7   : > { %v319_v59 = vadd.f32 %v1089_v56, %v318_v57  ;;  %v339_v60 = vadd.f32 %v1089_v56, %v338_v58 }
  0xc9   : > { %v398_v61 = vmax.f32 %v319_v59, 0.0  ;;  %v406_v62 = vmax.f32 %v339_v60, 0.0 }
  0xcb   : > { %v430_v63 = vadd.f32 %v398_v61, %v959_v8  ;;  %v438_v0 = vadd.f32 %v406_v62, %v965_v10 }
  0xcd   : > { %462 = vst [vmem:[%s1097_s8] sm:$0xff] %v430_v63  ;;  %v358_v1 = vpop.f32.mrf.mxu2  ;;  %v378_v2 = vpop.f32.mrf.mxu3 }
  0xce   : > { %470 = vst [vmem:[%s1097_s8 + $0x40] sm:$0xff] %v438_v0  ;;  %v359_v3 = vadd.f32 %v1089_v56, %v358_v1  ;;  %v379_v4 = vadd.f32 %v1089_v56, %v378_v2  ;;  %v320_v5 = vpop.f32.mrf.mxu0  ;;  %v340_v6 = vpop.f32.mrf.mxu1 }
  0xcf   : > { %v321_v7 = vadd.f32 %v1089_v56, %v320_v5  ;;  %v341_v8 = vadd.f32 %v1089_v56, %v340_v6 }
  0xd0   : > { %v414_v10 = vmax.f32 %v359_v3, 0.0  ;;  %v422_v16 = vmax.f32 %v379_v4, 0.0 }
  0xd1   : > { %v399_v17 = vmax.f32 %v321_v7, 0.0  ;;  %v407_v18 = vmax.f32 %v341_v8, 0.0 }
  0xd2   : > { %v446_v19 = vadd.f32 %v414_v10, %v971_v12  ;;  %v454_v28 = vadd.f32 %v422_v16, %v977_v14 }
  0xd3   : > { %v431_v29 = vadd.f32 %v399_v17, %v962_v9  ;;  %v439_v30 = vadd.f32 %v407_v18, %v968_v11 }
  0xd4   : > { %478 = vst [vmem:[%s1097_s8 + $0x80] sm:$0xff] %v446_v19 }
  0xd5   : > { %486 = vst [vmem:[%s1097_s8 + $0xc0] sm:$0xff] %v454_v28  ;;  %v360_v31 = vpop.f32.mrf.mxu2  ;;  %v380_v40 = vpop.f32.mrf.mxu3 }
  0xd6   : > { %463 = vst [vmem:[%s1097_s8 + $0x8] sm:$0xff] %v431_v29  ;;  %v361_v41 = vadd.f32 %v1089_v56, %v360_v31  ;;  %v381_v42 = vadd.f32 %v1089_v56, %v380_v40  ;;  %v323_v43 = vpop.f32.mrf.mxu0  ;;  %v343_v52 = vpop.f32.mrf.mxu1 }
  0xd7   : > { %471 = vst [vmem:[%s1097_s8 + $0x48] sm:$0xff] %v439_v30  ;;  %v324_v12 = vadd.f32 %v1089_v56, %v323_v43  ;;  %v344_v9 = vadd.f32 %v1089_v56, %v343_v52 }
  0xd8   : > { %v415_v11 = vmax.f32 %v361_v41, 0.0  ;;  %v423_v14 = vmax.f32 %v381_v42, 0.0 }
  0xd9   : > { %v400_v53 = vmax.f32 %v324_v12, 0.0  ;;  %v408_v54 = vmax.f32 %v344_v9, 0.0 }
  0xda   : > { %v447_v55 = vadd.f32 %v415_v11, %v974_v13  ;;  %v455_v57 = vadd.f32 %v423_v14, %v980_v15 }
  0xdb   : > { %v432_v58 = vadd.f32 %v400_v53, %v991_v20  ;;  %v440_v59 = vadd.f32 %v408_v54, %v997_v22 }
  0xdc   : > { %479 = vst [vmem:[%s1097_s8 + $0x88] sm:$0xff] %v447_v55 }
  0xdd   : > { %487 = vst [vmem:[%s1097_s8 + $0xc8] sm:$0xff] %v455_v57  ;;  %v363_v60 = vpop.f32.mrf.mxu2  ;;  %v383_v61 = vpop.f32.mrf.mxu3 }
  0xde   : > { %464 = vst [vmem:[%s1097_s8 + $0x10] sm:$0xff] %v432_v58  ;;  %v364_v62 = vadd.f32 %v1089_v56, %v363_v60  ;;  %v384_v63 = vadd.f32 %v1089_v56, %v383_v61  ;;  %v325_v0 = vpop.f32.mrf.mxu0  ;;  %v345_v1 = vpop.f32.mrf.mxu1 }
  0xdf   : > { %472 = vst [vmem:[%s1097_s8 + $0x50] sm:$0xff] %v440_v59  ;;  %v326_v13 = vadd.f32 %v1089_v56, %v325_v0  ;;  %v346_v15 = vadd.f32 %v1089_v56, %v345_v1 }
  0xe0   : > { %v416_v20 = vmax.f32 %v364_v62, 0.0  ;;  %v424_v22 = vmax.f32 %v384_v63, 0.0 }
  0xe1   : > { %v401_v2 = vmax.f32 %v326_v13, 0.0  ;;  %v409_v3 = vmax.f32 %v346_v15, 0.0 }
  0xe2   : > { %v448_v4 = vadd.f32 %v416_v20, %v1003_v24  ;;  %v456_v5 = vadd.f32 %v424_v22, %v1009_v26 }
  0xe3   : > { %v433_v6 = vadd.f32 %v401_v2, %v994_v21  ;;  %v441_v7 = vadd.f32 %v409_v3, %v1000_v23 }
  0xe4   : > { %480 = vst [vmem:[%s1097_s8 + $0x90] sm:$0xff] %v448_v4 }
  0xe5   : > { %488 = vst [vmem:[%s1097_s8 + $0xd0] sm:$0xff] %v456_v5  ;;  %v365_v8 = vpop.f32.mrf.mxu2  ;;  %v385_v10 = vpop.f32.mrf.mxu3 }
  0xe6   : > { %465 = vst [vmem:[%s1097_s8 + $0x18] sm:$0xff] %v433_v6  ;;  %v366_v16 = vadd.f32 %v1089_v56, %v365_v8  ;;  %v386_v17 = vadd.f32 %v1089_v56, %v385_v10  ;;  %v328_v18 = vpop.f32.mrf.mxu0  ;;  %v348_v19 = vpop.f32.mrf.mxu1 }
  0xe7   : > { %473 = vst [vmem:[%s1097_s8 + $0x58] sm:$0xff] %v441_v7  ;;  %v329_v24 = vadd.f32 %v1089_v56, %v328_v18  ;;  %v349_v21 = vadd.f32 %v1089_v56, %v348_v19 }
  0xe8   : > { %v417_v23 = vmax.f32 %v366_v16, 0.0  ;;  %v425_v26 = vmax.f32 %v386_v17, 0.0 }
  0xe9   : > { %v402_v28 = vmax.f32 %v329_v24, 0.0  ;;  %v410_v29 = vmax.f32 %v349_v21, 0.0 }
  0xea   : > { %v449_v30 = vadd.f32 %v417_v23, %v1006_v25  ;;  %v457_v31 = vadd.f32 %v425_v26, %v1012_v27 }
  0xeb   : > { %v434_v40 = vadd.f32 %v402_v28, %v1023_v32  ;;  %v442_v41 = vadd.f32 %v410_v29, %v1029_v34 }
  0xec   : > { %481 = vst [vmem:[%s1097_s8 + $0x98] sm:$0xff] %v449_v30 }
  0xed   : > { %489 = vst [vmem:[%s1097_s8 + $0xd8] sm:$0xff] %v457_v31  ;;  %v368_v42 = vpop.f32.mrf.mxu2  ;;  %v388_v43 = vpop.f32.mrf.mxu3 }
  0xee   : > { %466 = vst [vmem:[%s1097_s8 + $0x20] sm:$0xff] %v434_v40  ;;  %v369_v52 = vadd.f32 %v1089_v56, %v368_v42  ;;  %v389_v12 = vadd.f32 %v1089_v56, %v388_v43  ;;  %v330_v9 = vpop.f32.mrf.mxu0  ;;  %v350_v11 = vpop.f32.mrf.mxu1 }
  0xef   : > { %474 = vst [vmem:[%s1097_s8 + $0x60] sm:$0xff] %v442_v41  ;;  %v331_v25 = vadd.f32 %v1089_v56, %v330_v9  ;;  %v351_v27 = vadd.f32 %v1089_v56, %v350_v11 }
  0xf0   : > { %v418_v32 = vmax.f32 %v369_v52, 0.0  ;;  %v426_v34 = vmax.f32 %v389_v12, 0.0 }
  0xf1   : > { %v403_v14 = vmax.f32 %v331_v25, 0.0  ;;  %v411_v53 = vmax.f32 %v351_v27, 0.0 }
  0xf2   : > { %v450_v54 = vadd.f32 %v418_v32, %v1035_v36  ;;  %v458_v55 = vadd.f32 %v426_v34, %v1041_v38 }
  0xf3   : > { %v435_v57 = vadd.f32 %v403_v14, %v1026_v33  ;;  %v443_v58 = vadd.f32 %v411_v53, %v1032_v35 }
  0xf4   : > { %482 = vst [vmem:[%s1097_s8 + $0xa0] sm:$0xff] %v450_v54 }
  0xf5   : > { %490 = vst [vmem:[%s1097_s8 + $0xe0] sm:$0xff] %v458_v55  ;;  %v370_v59 = vpop.f32.mrf.mxu2  ;;  %v390_v60 = vpop.f32.mrf.mxu3 }
  0xf6   : > { %467 = vst [vmem:[%s1097_s8 + $0x28] sm:$0xff] %v435_v57  ;;  %v371_v61 = vadd.f32 %v1089_v56, %v370_v59  ;;  %v391_v62 = vadd.f32 %v1089_v56, %v390_v60  ;;  %v333_v63 = vpop.f32.mrf.mxu0  ;;  %v353_v0 = vpop.f32.mrf.mxu1 }
  0xf7   : > { %475 = vst [vmem:[%s1097_s8 + $0x68] sm:$0xff] %v443_v58  ;;  %v334_v36 = vadd.f32 %v1089_v56, %v333_v63  ;;  %v354_v33 = vadd.f32 %v1089_v56, %v353_v0 }
  0xf8   : > { %v419_v35 = vmax.f32 %v371_v61, 0.0  ;;  %v427_v38 = vmax.f32 %v391_v62, 0.0 }
  0xf9   : > { %v404_v1 = vmax.f32 %v334_v36, 0.0  ;;  %v412_v13 = vmax.f32 %v354_v33, 0.0 }
  0xfa   : > { %v451_v15 = vadd.f32 %v419_v35, %v1038_v37  ;;  %v459_v20 = vadd.f32 %v427_v38, %v1044_v39 }
  0xfb   : > { %v436_v22 = vadd.f32 %v404_v1, %v1055_v44  ;;  %v444_v2 = vadd.f32 %v412_v13, %v1061_v46 }
  0xfc   : > { %483 = vst [vmem:[%s1097_s8 + $0xa8] sm:$0xff] %v451_v15 }
  0xfd   : > { %491 = vst [vmem:[%s1097_s8 + $0xe8] sm:$0xff] %v459_v20  ;;  %v373_v3 = vpop.f32.mrf.mxu2  ;;  %v393_v4 = vpop.f32.mrf.mxu3 }
  0xfe   : > { %468 = vst [vmem:[%s1097_s8 + $0x30] sm:$0xff] %v436_v22  ;;  %v374_v5 = vadd.f32 %v1089_v56, %v373_v3  ;;  %v394_v6 = vadd.f32 %v1089_v56, %v393_v4  ;;  %v335_v7 = vpop.f32.mrf.mxu0  ;;  %v355_v37 = vpop.f32.mrf.mxu1 }
  0xff   : > { %476 = vst [vmem:[%s1097_s8 + $0x70] sm:$0xff] %v444_v2  ;;  %v336_v39 = vadd.f32 %v1089_v56, %v335_v7  ;;  %v356_v44 = vadd.f32 %v1089_v56, %v355_v37 }
 0x100   : > { %v420_v46 = vmax.f32 %v374_v5, 0.0  ;;  %v428_v8 = vmax.f32 %v394_v6, 0.0 }
 0x101   : > { %v405_v10 = vmax.f32 %v336_v39, 0.0  ;;  %v413_v16 = vmax.f32 %v356_v44, 0.0 }
 0x102   : > { %v452_v17 = vadd.f32 %v420_v46, %v1067_v48  ;;  %v460_v18 = vadd.f32 %v428_v8, %v1073_v50 }
 0x103   : > { %v437_v19 = vadd.f32 %v405_v10, %v1058_v45  ;;  %v445_v24 = vadd.f32 %v413_v16, %v1064_v47 }
 0x104   : > { %484 = vst [vmem:[%s1097_s8 + $0xb0] sm:$0xff] %v452_v17 }
 0x105   : > { %492 = vst [vmem:[%s1097_s8 + $0xf0] sm:$0xff] %v460_v18  ;;  %v375_v21 = vpop.f32.mrf.mxu2  ;;  %v395_v23 = vpop.f32.mrf.mxu3 }
 0x106   : > { %469 = vst [vmem:[%s1097_s8 + $0x38] sm:$0xff] %v437_v19  ;;  %v376_v48 = vadd.f32 %v1089_v56, %v375_v21  ;;  %v396_v50 = vadd.f32 %v1089_v56, %v395_v23 }
 0x107   : > { %477 = vst [vmem:[%s1097_s8 + $0x78] sm:$0xff] %v445_v24 }
 0x108   : > { %v421_v45 = vmax.f32 %v376_v48, 0.0  ;;  %v429_v47 = vmax.f32 %v396_v50, 0.0 }
 0x10a   : > { %v453_v26 = vadd.f32 %v421_v45, %v1070_v49  ;;  %v461_v28 = vadd.f32 %v429_v47, %v1076_v51 }
 0x10c   : > { %485 = vst [vmem:[%s1097_s8 + $0xb8] sm:$0xff] %v453_v26 }
 0x10d   : > { %493 = vst [vmem:[%s1097_s8 + $0xf8] sm:$0xff] %v461_v28 }
 0x10e   : > { %771 = shalt.err (!%p768_p4)
}
 0x10f   : > { %s814_s29 = smov 128   ;;  %s815_s5 = smov 8  }
 0x110   : > { %665 = dma.vmem_to_hbm [thread:$0]  (%p886_p11), %s508_s16, 4096, %s510_s23, %s495_s17, %s814_s29, %s814_s29, %s815_s5  }
 0x111 PF: > { %s524_s7 = sand.u32 1, %s798_s12   ;;  %p1234_p7 = scmp.ge.s32.totalorder %s810_s15, 2 }
 0x112   : > { %s525_s6 = scalar_lea.sflag [#allocation4], %s524_s7 }
 0x113   : > { %p672_p5 = pnand %p1234_p7, %p890_p12 }
 0x115   : > { %p673_p8 = pneg %p672_p5 }
 0x117   : > { %793 = dma.done.wait (%p673_p8), %s525_s6, 4096  }
 0x118   : > { %795 = vsyncadd (%p673_p8), %s525_s6, 4294963200  ;;  %p16_p10 = scmp.ge.s32.totalorder %s861_s18, 4   ;;  %s1235_s12 = smov %s802_s13 }
 0x119   : > { %s1236_s13 = smov %s806_s14  ;;  %s1237_s14 = smov %s873_s21 }
 0x11a   : > { %s1238_s15 = smov %s861_s18  ;;  %18 = sbr.rel (!%p16_p10) target bundleno = 5 (0x5), region = 77 }
 0x11f   :  { %531 = vsyncpa [#allocation3], 1 }
 0x120   :  { %533 = vsyncpa [#allocation3 + $0x1], 1 }
 0x121   :  { %534 = vsyncpa [#allocation4], 1 }
 0x122   :  { %536 = vsyncpa [#allocation4 + $0x1], 1 }

</bundles_post_ra>
